<compile_context>
chip_gen: v7x
topology: tpu7x:2x2x1
jax: 0.10.0
libtpu: 0.0.40
codegen_flags: <defaults>
</compile_context>

<pallas_src>
import jax
import jax.numpy as jnp
from jax import lax
from jax.experimental import pallas as pl
from jax.experimental.pallas import tpu as pltpu

NEG_SLOPE = 0.2                          # PyG GATConv default negative_slope
_VMEM_LIMIT = 48 * 1024 * 1024           # > 16/32 MiB defaults, < v7x 64 MiB physical


# ----------------------------------------------------------------------------
# Kernels
# ----------------------------------------------------------------------------
def _attend(e_dst_col, e_src_row, feats_bf, mask_bias):
    """Masked softmax over source nodes + attention-weighted aggregation.

    e_dst_col: [N, 1] f32, e_src_row: [1, N] f32, feats_bf: [N, F] bf16,
    mask_bias: [N, N] f32 additive bias (0 for edges, -1e9 for non-edges).
    """
    logits = e_dst_col + e_src_row                                   # [N, N]
    logits = jnp.where(logits > 0, logits, NEG_SLOPE * logits)       # LeakyReLU(0.2)
    logits = logits + mask_bias                                      # additive edge mask
    m = jnp.max(logits, axis=1, keepdims=True)                       # row max (self-loop => finite)
    p = jnp.exp(logits - m)
    inv = pl.reciprocal(jnp.sum(p, axis=1, keepdims=True), approx=True)   # EUP
    alpha = (p * inv).astype(jnp.bfloat16)                           # [N, N]
    return jnp.dot(alpha, feats_bf, preferred_element_type=jnp.float32)   # [N, F]


def encoder_kernel(x_ref, mask_ref, eps_ref,
                   w1_ref, spd_ref, sps_ref, b1_ref, w2_ref,
                   a2s_ref, a2d_ref, b2_ref,
                   muw_ref, mub_ref, lvw_ref, lvb_ref,
                   zmean_ref):
    f32, bf16 = jnp.float32, jnp.bfloat16
    num_heads = w1_ref.shape[0]
    n_nodes = x_ref.shape[0]
    emb_size = w2_ref.shape[2]

    x_bf = x_ref[...].astype(bf16)
    mask_bias = mask_ref[...]

    # Fused attention scores for ALL layer-1 heads (2 MXU ops total):
    #   e_dst_all[n, h] = <W1_h x_n, a_dst_h>,  e_src_all[h, n] = <W1_h x_n, a_src_h>
    e_dst_all = jnp.dot(x_bf, spd_ref[...], preferred_element_type=f32)        # [N, H]
    e_src_all = lax.dot_general(sps_ref[...], x_bf, (((1,), (1,)), ((), ())),
                                preferred_element_type=f32)                    # [H, N]

    # ---- GAT layer 1 (heads=H, concat=True) + ReLU; concat folded into W2 ---
    h2 = jnp.zeros((n_nodes, emb_size), f32)
    # NOTE: static unroll is optimal at H=2 / N=16; for many heads or large N
    # move heads to a grid axis (or lax.fori_loop) to bound [N,N] live ranges.
    for hd in range(num_heads):
        feats = jnp.dot(x_bf, w1_ref[hd], preferred_element_type=f32)          # [N, F1]
        agg = _attend(e_dst_all[:, hd:hd + 1], e_src_all[hd:hd + 1, :],
                      feats.astype(bf16), mask_bias)                           # [N, F1]
        hidden = jnp.maximum(agg + b1_ref[hd], 0.0)                            # bias + ReLU
        h2 = h2 + jnp.dot(hidden.astype(bf16), w2_ref[hd],
                          preferred_element_type=f32)                          # [N, E]

    # ---- GAT layer 2 (heads=1, concat=False) --------------------------------
    h2_bf = h2.astype(bf16)
    e_dst2 = jnp.dot(h2_bf, a2d_ref[...], preferred_element_type=f32)          # [N, 1]
    e_src2 = lax.dot_general(a2s_ref[...], h2_bf, (((1,), (1,)), ((), ())),
                             preferred_element_type=f32)                       # [1, N]
    emb = _attend(e_dst2, e_src2, h2_bf, mask_bias) + b2_ref[...]              # [N, E]

    # ---- VGAE heads + reparameterize + mean over nodes (all f32) -----------
    emb_bf = emb.astype(bf16)
    mu = jnp.dot(emb_bf, muw_ref[...], preferred_element_type=f32) + mub_ref[...]
    log_var = jnp.dot(emb_bf, lvw_ref[...], preferred_element_type=f32) + lvb_ref[...]
    z = mu + eps_ref[...] * jnp.exp(0.5 * log_var)                             # [N, E]
    zmean_ref[...] = jnp.mean(z, axis=0, keepdims=True)                        # [1, E]


def decoder_kernel(zmean_ref, decw_ref, decb_ref, out_ref):
    """One lane-dense tile of sigmoid(z_mean @ dec_w + dec_b)."""
    zm_bf = zmean_ref[...].astype(jnp.bfloat16)
    dec = jnp.dot(zm_bf, decw_ref[...], preferred_element_type=jnp.float32) + decb_ref[...]
    # sigmoid(x) = 0.5*tanh(0.5*x) + 0.5  — EUP op, no divide, no overflow.
    out_ref[...] = 0.5 * jnp.tanh(0.5 * dec) + 0.5


# ----------------------------------------------------------------------------
# Wrapper
# ----------------------------------------------------------------------------
def gat_vgae_forward(prepared, mask_bias, x, eps, *, num_nodes):
    emb_size = prepared["mu_w"].shape[1]
    vmem = pl.BlockSpec(memory_space=pltpu.MemorySpace.VMEM)

    enc_args = (x, mask_bias, eps,
                prepared["w1h"], prepared["sp_dst"], prepared["sp_src_t"],
                prepared["b1h"], prepared["w2h"],
                prepared["a2_src"], prepared["a2_dst"], prepared["b2"],
                prepared["mu_w"], prepared["mu_b"],
                prepared["lv_w"], prepared["lv_b"])
    z_mean = pl.pallas_call(
        encoder_kernel,
        out_shape=jax.ShapeDtypeStruct((1, emb_size), jnp.float32),
        in_specs=[vmem] * len(enc_args),
        out_specs=vmem,
        compiler_params=pltpu.CompilerParams(vmem_limit_bytes=_VMEM_LIMIT),
    )(*enc_args)

    # Decoder: tile the [1, N*N] GEMV output with lane-dense 128-wide blocks,
    # streaming dec_w from HBM, grid axis marked "parallel" (dual-TC on v7x).
    n2 = num_nodes * num_nodes
    tile = 128 if n2 % 128 == 0 else n2
    dec = pl.pallas_call(
        decoder_kernel,
        out_shape=jax.ShapeDtypeStruct((1, n2), jnp.float32),
        grid=(n2 // tile,),
        in_specs=[pl.BlockSpec((1, emb_size), lambda i: (0, 0)),
                  pl.BlockSpec((emb_size, tile), lambda i: (0, i)),
                  pl.BlockSpec((1, tile), lambda i: (0, i))],
        out_specs=pl.BlockSpec((1, tile), lambda i: (0, i)),
        compiler_params=pltpu.CompilerParams(
            dimension_semantics=("parallel",),
            vmem_limit_bytes=_VMEM_LIMIT),
    )(z_mean, prepared["dec_w"], prepared["dec_b"])

    # PyTorch's .view(num_nodes, num_nodes) — reshape glue outside the kernel
    # so the in-kernel stores stay lane-dense [1, N*N].
    return dec.reshape(num_nodes, num_nodes)


# ----------------------------------------------------------------------------
# Parameters
# ----------------------------------------------------------------------------
def init_params(key, num_features, num_neurons, embedding_size, num_heads, num_nodes):
    """Torch-equivalent parameters (Linear weights stored pre-transposed [in,out])."""
    ks = jax.random.split(key, 9)
    s = 0.1
    f32 = jnp.float32
    return {
        "w1":     s * jax.random.normal(ks[0], (num_features, num_heads * num_neurons), f32),
        "a1_src": s * jax.random.normal(ks[1], (num_heads, num_neurons), f32),
        "a1_dst": s * jax.random.normal(ks[2], (num_heads, num_neurons), f32),
        "b1":     jnp.zeros((1, num_heads * num_neurons), f32),
        "w2":     s * jax.random.normal(ks[3], (num_heads * num_neurons, embedding_size), f32),
        "a2_src": s * jax.random.normal(ks[4], (1, embedding_size), f32),
        "a2_dst": s * jax.random.normal(ks[5], (1, embedding_size), f32),
        "b2":     jnp.zeros((1, embedding_size), f32),
        "mu_w":   s * jax.random.normal(ks[6], (embedding_size, embedding_size), f32),
        "mu_b":   jnp.zeros((1, embedding_size), f32),
        "lv_w":   s * jax.random.normal(ks[7], (embedding_size, embedding_size), f32),
        "lv_b":   jnp.zeros((1, embedding_size), f32),
        "dec_w":  s * jax.random.normal(ks[8], (embedding_size, num_nodes * num_nodes), f32),
        "dec_b":  jnp.zeros((1, num_nodes * num_nodes), f32),
    }


def prepare_params(p, *, num_features, num_neurons, embedding_size, num_heads):
    """Re-lay out parameters for the kernel (wrapper-side, one-time).

    - w1 split per head -> [H, F, F1] (no in-kernel lane slicing of h1).
    - GAT `a` vectors folded into W1: score_proj_h = W1_h @ a_h, so the
      per-head e_src / e_dst scores come from fused MXU matmuls on x.
    - w2 / b1 split per head so the head concat folds into the layer-2 matmul.
    - MXU operands cast to bf16; biases and mask stay f32.
    """
    F, F1, E, H = num_features, num_neurons, embedding_size, num_heads
    bf16 = jnp.bfloat16
    w1h = p["w1"].reshape(F, H, F1).transpose(1, 0, 2)               # [H, F, F1]
    sp_dst = jnp.einsum("hfk,hk->fh", w1h, p["a1_dst"])              # [F, H]
    sp_src_t = jnp.einsum("hfk,hk->hf", w1h, p["a1_src"])            # [H, F]
    return {
        "w1h":      w1h.astype(bf16),
        "sp_dst":   sp_dst.astype(bf16),
        "sp_src_t": sp_src_t.astype(bf16),
        "b1h":      p["b1"].reshape(H, 1, F1),
        "w2h":      p["w2"].reshape(H, F1, E).astype(bf16),
        "a2_src":   p["a2_src"].astype(bf16),                        # [1, E]
        "a2_dst":   p["a2_dst"].reshape(E, 1).astype(bf16),          # [E, 1]
        "b2":       p["b2"],
        "mu_w":     p["mu_w"].astype(bf16), "mu_b": p["mu_b"],
        "lv_w":     p["lv_w"].astype(bf16), "lv_b": p["lv_b"],
        "dec_w":    p["dec_w"].astype(bf16), "dec_b": p["dec_b"],
    }


def edge_index_to_dense_adj(edge_index, num_nodes):
    """edge_index: [2, E] int32 (row 0 = source, row 1 = target), PyG convention."""
    src, dst = edge_index[0], edge_index[1]
    adj = jnp.zeros((num_nodes, num_nodes), jnp.float32).at[dst, src].set(1.0)
    # GATConv default add_self_loops=True
    return jnp.maximum(adj, jnp.eye(num_nodes, dtype=jnp.float32))


def adj_to_mask_bias(adj):
    """Additive softmax mask: 0 for edges, -1e9 for non-edges."""
    return jnp.where(adj > 0, 0.0, -1e9).astype(jnp.float32)


# ----------------------------------------------------------------------------
# Demo
# ----------------------------------------------------------------------------
if __name__ == "__main__":
    num_nodes = 16
    num_features = 8
    num_neurons = 8
    embedding_size = 8
    num_heads = 2

    key = jax.random.PRNGKey(0)
    k_param, k_x, k_eps = jax.random.split(key, 3)

    params = init_params(k_param, num_features, num_neurons,
                         embedding_size, num_heads, num_nodes)
    prepared = prepare_params(params, num_features=num_features,
                              num_neurons=num_neurons,
                              embedding_size=embedding_size,
                              num_heads=num_heads)

    # Deterministic ring graph (both directions), PyG edge_index format [2, E].
    idx = jnp.arange(num_nodes, dtype=jnp.int32)
    src = jnp.concatenate([idx, (idx + 1) % num_nodes])
    dst = jnp.concatenate([(idx + 1) % num_nodes, idx])
    edge_index = jnp.stack([src, dst], axis=0)                        # [2, 2*N]
    adj = edge_index_to_dense_adj(edge_index, num_nodes)              # [N, N]
    mask_bias = adj_to_mask_bias(adj)                                 # [N, N]

    x = jax.random.normal(k_x, (num_nodes, num_features), jnp.float32)
    # torch.randn_like(std) — reparameterization noise sampled deterministically
    # in the wrapper and passed in (could be pltpu.prng_* in-kernel instead).
    eps = jax.random.normal(k_eps, (num_nodes, embedding_size), jnp.float32)

    recon = gat_vgae_forward(prepared, mask_bias, x, eps, num_nodes=num_nodes)
    recon = jax.block_until_ready(recon)
    assert recon.shape == (num_nodes, num_nodes)
    assert bool(jnp.all(jnp.isfinite(recon)))
    print("KERNEL_OK")
</pallas_src>

<mosaic_0001>
module attributes {stable_mosaic.version = 11 : i64} {
  func.func @encoder_kernel(%arg0: memref<16x8xf32, #tpu.memory_space<vmem>>, %arg1: memref<16x16xf32, #tpu.memory_space<vmem>>, %arg2: memref<16x8xf32, #tpu.memory_space<vmem>>, %arg3: memref<2x8x8xbf16, #tpu.memory_space<vmem>>, %arg4: memref<8x2xbf16, #tpu.memory_space<vmem>>, %arg5: memref<2x8xbf16, #tpu.memory_space<vmem>>, %arg6: memref<2x1x8xf32, #tpu.memory_space<vmem>>, %arg7: memref<2x8x8xbf16, #tpu.memory_space<vmem>>, %arg8: memref<1x8xbf16, #tpu.memory_space<vmem>>, %arg9: memref<8x1xbf16, #tpu.memory_space<vmem>>, %arg10: memref<1x8xf32, #tpu.memory_space<vmem>>, %arg11: memref<8x8xbf16, #tpu.memory_space<vmem>>, %arg12: memref<1x8xf32, #tpu.memory_space<vmem>>, %arg13: memref<8x8xbf16, #tpu.memory_space<vmem>>, %arg14: memref<1x8xf32, #tpu.memory_space<vmem>>, %arg15: memref<1x8xf32, #tpu.memory_space<vmem>>) attributes {dimension_semantics = [], scalar_prefetch = 0 : i64, scratch_operands = 0 : i64, tpu.core_type = #tpu.core_type<tc>} {
    %c0 = arith.constant 0 : index
    %c0_0 = arith.constant 0 : index
    %0 = vector.load %arg0[%c0, %c0_0] : memref<16x8xf32, #tpu.memory_space<vmem>>, vector<16x8xf32>
    %1 = arith.truncf %0 : vector<16x8xf32> to vector<16x8xbf16>
    %c0_1 = arith.constant 0 : index
    %c0_2 = arith.constant 0 : index
    %2 = vector.load %arg1[%c0_1, %c0_2] : memref<16x16xf32, #tpu.memory_space<vmem>>, vector<16x16xf32>
    %c0_3 = arith.constant 0 : index
    %c0_4 = arith.constant 0 : index
    %3 = vector.load %arg4[%c0_3, %c0_4] : memref<8x2xbf16, #tpu.memory_space<vmem>>, vector<8x2xbf16>
    %cst = arith.constant dense<0.000000e+00> : vector<16x2xf32>
    %4 = tpu.matmul %1, %3, %cst {dimension_numbers = #tpu.dot_dimension_numbers<[1], [0], [0], [1], [0, 0, 1, 1], [], []>} : vector<16x8xbf16>, vector<8x2xbf16>, vector<16x2xf32> -> vector<16x2xf32>
    %c0_5 = arith.constant 0 : index
    %c0_6 = arith.constant 0 : index
    %5 = vector.load %arg5[%c0_5, %c0_6] : memref<2x8xbf16, #tpu.memory_space<vmem>>, vector<2x8xbf16>
    %cst_7 = arith.constant dense<0.000000e+00> : vector<2x16xf32>
    %6 = tpu.matmul %5, %1, %cst_7 {dimension_numbers = #tpu.dot_dimension_numbers<[1], [1], [0], [0], [0, 0, 1, 0], [], []>} : vector<2x8xbf16>, vector<16x8xbf16>, vector<2x16xf32> -> vector<2x16xf32>
    %cst_8 = arith.constant 0.000000e+00 : f32
    %7 = vector.broadcast %cst_8 : f32 to vector<16x8xf32>
    %c0_9 = arith.constant 0 : index
    %c0_10 = arith.constant 0 : index
    %c0_11 = arith.constant 0 : index
    %8 = vector.load %arg3[%c0_9, %c0_10, %c0_11] : memref<2x8x8xbf16, #tpu.memory_space<vmem>>, vector<1x8x8xbf16>
    %9 = vector.shape_cast %8 : vector<1x8x8xbf16> to vector<8x8xbf16>
    %cst_12 = arith.constant dense<0.000000e+00> : vector<16x8xf32>
    %10 = tpu.matmul %1, %9, %cst_12 {dimension_numbers = #tpu.dot_dimension_numbers<[1], [0], [0], [1], [0, 0, 1, 1], [], []>} : vector<16x8xbf16>, vector<8x8xbf16>, vector<16x8xf32> -> vector<16x8xf32>
    %11 = vector.extract_strided_slice %4 {offsets = [0, 0], sizes = [16, 1], strides = [1, 1]} : vector<16x2xf32> to vector<16x1xf32>
    %12 = vector.extract_strided_slice %6 {offsets = [0, 0], sizes = [1, 16], strides = [1, 1]} : vector<2x16xf32> to vector<1x16xf32>
    %13 = arith.truncf %10 : vector<16x8xf32> to vector<16x8xbf16>
    %14 = vector.broadcast %11 : vector<16x1xf32> to vector<16x16xf32>
    %15 = vector.broadcast %12 : vector<1x16xf32> to vector<16x16xf32>
    %16 = arith.addf %14, %15 : vector<16x16xf32>
    %cst_13 = arith.constant 0.000000e+00 : f32
    %17 = vector.broadcast %cst_13 : f32 to vector<16x16xf32>
    %18 = arith.cmpf ogt, %16, %17 : vector<16x16xf32>
    %cst_14 = arith.constant 2.000000e-01 : f32
    %19 = vector.broadcast %cst_14 : f32 to vector<16x16xf32>
    %20 = arith.mulf %19, %16 : vector<16x16xf32>
    %21 = arith.select %18, %16, %20 : vector<16x16xi1>, vector<16x16xf32>
    %22 = arith.addf %21, %2 : vector<16x16xf32>
    %cst_15 = arith.constant dense<0xFF800000> : vector<16xf32>
    %23 = vector.multi_reduction <maximumf>, %22, %cst_15 [1] : vector<16x16xf32> to vector<16xf32>
    %24 = vector.shape_cast %23 : vector<16xf32> to vector<16x1xf32>
    %25 = vector.broadcast %24 : vector<16x1xf32> to vector<16x16xf32>
    %26 = arith.subf %22, %25 : vector<16x16xf32>
    %27 = math.exp %26 : vector<16x16xf32>
    %cst_16 = arith.constant dense<0.000000e+00> : vector<16xf32>
    %28 = vector.multi_reduction <add>, %27, %cst_16 [1] : vector<16x16xf32> to vector<16xf32>
    %29 = vector.shape_cast %28 : vector<16xf32> to vector<16x1xf32>
    %30 = tpu.reciprocal %29 {approx = true} : vector<16x1xf32> -> vector<16x1xf32>
    %31 = vector.broadcast %30 : vector<16x1xf32> to vector<16x16xf32>
    %32 = arith.mulf %27, %31 : vector<16x16xf32>
    %33 = arith.truncf %32 : vector<16x16xf32> to vector<16x16xbf16>
    %cst_17 = arith.constant dense<0.000000e+00> : vector<16x8xf32>
    %34 = tpu.matmul %33, %13, %cst_17 {dimension_numbers = #tpu.dot_dimension_numbers<[1], [0], [0], [1], [0, 0, 1, 1], [], []>} : vector<16x16xbf16>, vector<16x8xbf16>, vector<16x8xf32> -> vector<16x8xf32>
    %c0_18 = arith.constant 0 : index
    %c0_19 = arith.constant 0 : index
    %c0_20 = arith.constant 0 : index
    %35 = vector.load %arg6[%c0_18, %c0_19, %c0_20] : memref<2x1x8xf32, #tpu.memory_space<vmem>>, vector<1x1x8xf32>
    %36 = vector.shape_cast %35 : vector<1x1x8xf32> to vector<1x8xf32>
    %37 = vector.broadcast %36 : vector<1x8xf32> to vector<16x8xf32>
    %38 = arith.addf %34, %37 : vector<16x8xf32>
    %cst_21 = arith.constant 0.000000e+00 : f32
    %39 = vector.broadcast %cst_21 : f32 to vector<16x8xf32>
    %40 = arith.maximumf %38, %39 : vector<16x8xf32>
    %41 = arith.truncf %40 : vector<16x8xf32> to vector<16x8xbf16>
    %c0_22 = arith.constant 0 : index
    %c0_23 = arith.constant 0 : index
    %c0_24 = arith.constant 0 : index
    %42 = vector.load %arg7[%c0_22, %c0_23, %c0_24] : memref<2x8x8xbf16, #tpu.memory_space<vmem>>, vector<1x8x8xbf16>
    %43 = vector.shape_cast %42 : vector<1x8x8xbf16> to vector<8x8xbf16>
    %cst_25 = arith.constant dense<0.000000e+00> : vector<16x8xf32>
    %44 = tpu.matmul %41, %43, %cst_25 {dimension_numbers = #tpu.dot_dimension_numbers<[1], [0], [0], [1], [0, 0, 1, 1], [], []>} : vector<16x8xbf16>, vector<8x8xbf16>, vector<16x8xf32> -> vector<16x8xf32>
    %45 = arith.addf %7, %44 : vector<16x8xf32>
    %c1 = arith.constant 1 : index
    %c0_26 = arith.constant 0 : index
    %c0_27 = arith.constant 0 : index
    %46 = vector.load %arg3[%c1, %c0_26, %c0_27] : memref<2x8x8xbf16, #tpu.memory_space<vmem>>, vector<1x8x8xbf16>
    %47 = vector.shape_cast %46 : vector<1x8x8xbf16> to vector<8x8xbf16>
    %cst_28 = arith.constant dense<0.000000e+00> : vector<16x8xf32>
    %48 = tpu.matmul %1, %47, %cst_28 {dimension_numbers = #tpu.dot_dimension_numbers<[1], [0], [0], [1], [0, 0, 1, 1], [], []>} : vector<16x8xbf16>, vector<8x8xbf16>, vector<16x8xf32> -> vector<16x8xf32>
    %49 = vector.extract_strided_slice %4 {offsets = [0, 1], sizes = [16, 1], strides = [1, 1]} : vector<16x2xf32> to vector<16x1xf32>
    %50 = vector.extract_strided_slice %6 {offsets = [1, 0], sizes = [1, 16], strides = [1, 1]} : vector<2x16xf32> to vector<1x16xf32>
    %51 = arith.truncf %48 : vector<16x8xf32> to vector<16x8xbf16>
    %52 = vector.broadcast %49 : vector<16x1xf32> to vector<16x16xf32>
    %53 = vector.broadcast %50 : vector<1x16xf32> to vector<16x16xf32>
    %54 = arith.addf %52, %53 : vector<16x16xf32>
    %cst_29 = arith.constant 0.000000e+00 : f32
    %55 = vector.broadcast %cst_29 : f32 to vector<16x16xf32>
    %56 = arith.cmpf ogt, %54, %55 : vector<16x16xf32>
    %cst_30 = arith.constant 2.000000e-01 : f32
    %57 = vector.broadcast %cst_30 : f32 to vector<16x16xf32>
    %58 = arith.mulf %57, %54 : vector<16x16xf32>
    %59 = arith.select %56, %54, %58 : vector<16x16xi1>, vector<16x16xf32>
    %60 = arith.addf %59, %2 : vector<16x16xf32>
    %cst_31 = arith.constant dense<0xFF800000> : vector<16xf32>
    %61 = vector.multi_reduction <maximumf>, %60, %cst_31 [1] : vector<16x16xf32> to vector<16xf32>
    %62 = vector.shape_cast %61 : vector<16xf32> to vector<16x1xf32>
    %63 = vector.broadcast %62 : vector<16x1xf32> to vector<16x16xf32>
    %64 = arith.subf %60, %63 : vector<16x16xf32>
    %65 = math.exp %64 : vector<16x16xf32>
    %cst_32 = arith.constant dense<0.000000e+00> : vector<16xf32>
    %66 = vector.multi_reduction <add>, %65, %cst_32 [1] : vector<16x16xf32> to vector<16xf32>
    %67 = vector.shape_cast %66 : vector<16xf32> to vector<16x1xf32>
    %68 = tpu.reciprocal %67 {approx = true} : vector<16x1xf32> -> vector<16x1xf32>
    %69 = vector.broadcast %68 : vector<16x1xf32> to vector<16x16xf32>
    %70 = arith.mulf %65, %69 : vector<16x16xf32>
    %71 = arith.truncf %70 : vector<16x16xf32> to vector<16x16xbf16>
    %cst_33 = arith.constant dense<0.000000e+00> : vector<16x8xf32>
    %72 = tpu.matmul %71, %51, %cst_33 {dimension_numbers = #tpu.dot_dimension_numbers<[1], [0], [0], [1], [0, 0, 1, 1], [], []>} : vector<16x16xbf16>, vector<16x8xbf16>, vector<16x8xf32> -> vector<16x8xf32>
    %c1_34 = arith.constant 1 : index
    %c0_35 = arith.constant 0 : index
    %c0_36 = arith.constant 0 : index
    %73 = vector.load %arg6[%c1_34, %c0_35, %c0_36] : memref<2x1x8xf32, #tpu.memory_space<vmem>>, vector<1x1x8xf32>
    %74 = vector.shape_cast %73 : vector<1x1x8xf32> to vector<1x8xf32>
    %75 = vector.broadcast %74 : vector<1x8xf32> to vector<16x8xf32>
    %76 = arith.addf %72, %75 : vector<16x8xf32>
    %cst_37 = arith.constant 0.000000e+00 : f32
    %77 = vector.broadcast %cst_37 : f32 to vector<16x8xf32>
    %78 = arith.maximumf %76, %77 : vector<16x8xf32>
    %79 = arith.truncf %78 : vector<16x8xf32> to vector<16x8xbf16>
    %c1_38 = arith.constant 1 : index
    %c0_39 = arith.constant 0 : index
    %c0_40 = arith.constant 0 : index
    %80 = vector.load %arg7[%c1_38, %c0_39, %c0_40] : memref<2x8x8xbf16, #tpu.memory_space<vmem>>, vector<1x8x8xbf16>
    %81 = vector.shape_cast %80 : vector<1x8x8xbf16> to vector<8x8xbf16>
    %cst_41 = arith.constant dense<0.000000e+00> : vector<16x8xf32>
    %82 = tpu.matmul %79, %81, %cst_41 {dimension_numbers = #tpu.dot_dimension_numbers<[1], [0], [0], [1], [0, 0, 1, 1], [], []>} : vector<16x8xbf16>, vector<8x8xbf16>, vector<16x8xf32> -> vector<16x8xf32>
    %83 = arith.addf %45, %82 : vector<16x8xf32>
    %84 = arith.truncf %83 : vector<16x8xf32> to vector<16x8xbf16>
    %c0_42 = arith.constant 0 : index
    %c0_43 = arith.constant 0 : index
    %85 = vector.load %arg9[%c0_42, %c0_43] : memref<8x1xbf16, #tpu.memory_space<vmem>>, vector<8x1xbf16>
    %cst_44 = arith.constant dense<0.000000e+00> : vector<16x1xf32>
    %86 = tpu.matmul %84, %85, %cst_44 {dimension_numbers = #tpu.dot_dimension_numbers<[1], [0], [0], [1], [0, 0, 1, 1], [], []>} : vector<16x8xbf16>, vector<8x1xbf16>, vector<16x1xf32> -> vector<16x1xf32>
    %c0_45 = arith.constant 0 : index
    %c0_46 = arith.constant 0 : index
    %87 = vector.load %arg8[%c0_45, %c0_46] : memref<1x8xbf16, #tpu.memory_space<vmem>>, vector<1x8xbf16>
    %cst_47 = arith.constant dense<0.000000e+00> : vector<1x16xf32>
    %88 = tpu.matmul %87, %84, %cst_47 {dimension_numbers = #tpu.dot_dimension_numbers<[1], [1], [0], [0], [0, 0, 1, 0], [], []>} : vector<1x8xbf16>, vector<16x8xbf16>, vector<1x16xf32> -> vector<1x16xf32>
    %89 = vector.broadcast %86 : vector<16x1xf32> to vector<16x16xf32>
    %90 = vector.broadcast %88 : vector<1x16xf32> to vector<16x16xf32>
    %91 = arith.addf %89, %90 : vector<16x16xf32>
    %cst_48 = arith.constant 0.000000e+00 : f32
    %92 = vector.broadcast %cst_48 : f32 to vector<16x16xf32>
    %93 = arith.cmpf ogt, %91, %92 : vector<16x16xf32>
    %cst_49 = arith.constant 2.000000e-01 : f32
    %94 = vector.broadcast %cst_49 : f32 to vector<16x16xf32>
    %95 = arith.mulf %94, %91 : vector<16x16xf32>
    %96 = arith.select %93, %91, %95 : vector<16x16xi1>, vector<16x16xf32>
    %97 = arith.addf %96, %2 : vector<16x16xf32>
    %cst_50 = arith.constant dense<0xFF800000> : vector<16xf32>
    %98 = vector.multi_reduction <maximumf>, %97, %cst_50 [1] : vector<16x16xf32> to vector<16xf32>
    %99 = vector.shape_cast %98 : vector<16xf32> to vector<16x1xf32>
    %100 = vector.broadcast %99 : vector<16x1xf32> to vector<16x16xf32>
    %101 = arith.subf %97, %100 : vector<16x16xf32>
    %102 = math.exp %101 : vector<16x16xf32>
    %cst_51 = arith.constant dense<0.000000e+00> : vector<16xf32>
    %103 = vector.multi_reduction <add>, %102, %cst_51 [1] : vector<16x16xf32> to vector<16xf32>
    %104 = vector.shape_cast %103 : vector<16xf32> to vector<16x1xf32>
    %105 = tpu.reciprocal %104 {approx = true} : vector<16x1xf32> -> vector<16x1xf32>
    %106 = vector.broadcast %105 : vector<16x1xf32> to vector<16x16xf32>
    %107 = arith.mulf %102, %106 : vector<16x16xf32>
    %108 = arith.truncf %107 : vector<16x16xf32> to vector<16x16xbf16>
    %cst_52 = arith.constant dense<0.000000e+00> : vector<16x8xf32>
    %109 = tpu.matmul %108, %84, %cst_52 {dimension_numbers = #tpu.dot_dimension_numbers<[1], [0], [0], [1], [0, 0, 1, 1], [], []>} : vector<16x16xbf16>, vector<16x8xbf16>, vector<16x8xf32> -> vector<16x8xf32>
    %c0_53 = arith.constant 0 : index
    %c0_54 = arith.constant 0 : index
    %110 = vector.load %arg10[%c0_53, %c0_54] : memref<1x8xf32, #tpu.memory_space<vmem>>, vector<1x8xf32>
    %111 = vector.broadcast %110 : vector<1x8xf32> to vector<16x8xf32>
    %112 = arith.addf %109, %111 : vector<16x8xf32>
    %113 = arith.truncf %112 : vector<16x8xf32> to vector<16x8xbf16>
    %c0_55 = arith.constant 0 : index
    %c0_56 = arith.constant 0 : index
    %114 = vector.load %arg11[%c0_55, %c0_56] : memref<8x8xbf16, #tpu.memory_space<vmem>>, vector<8x8xbf16>
    %cst_57 = arith.constant dense<0.000000e+00> : vector<16x8xf32>
    %115 = tpu.matmul %113, %114, %cst_57 {dimension_numbers = #tpu.dot_dimension_numbers<[1], [0], [0], [1], [0, 0, 1, 1], [], []>} : vector<16x8xbf16>, vector<8x8xbf16>, vector<16x8xf32> -> vector<16x8xf32>
    %c0_58 = arith.constant 0 : index
    %c0_59 = arith.constant 0 : index
    %116 = vector.load %arg12[%c0_58, %c0_59] : memref<1x8xf32, #tpu.memory_space<vmem>>, vector<1x8xf32>
    %117 = vector.broadcast %116 : vector<1x8xf32> to vector<16x8xf32>
    %118 = arith.addf %115, %117 : vector<16x8xf32>
    %c0_60 = arith.constant 0 : index
    %c0_61 = arith.constant 0 : index
    %119 = vector.load %arg13[%c0_60, %c0_61] : memref<8x8xbf16, #tpu.memory_space<vmem>>, vector<8x8xbf16>
    %cst_62 = arith.constant dense<0.000000e+00> : vector<16x8xf32>
    %120 = tpu.matmul %113, %119, %cst_62 {dimension_numbers = #tpu.dot_dimension_numbers<[1], [0], [0], [1], [0, 0, 1, 1], [], []>} : vector<16x8xbf16>, vector<8x8xbf16>, vector<16x8xf32> -> vector<16x8xf32>
    %c0_63 = arith.constant 0 : index
    %c0_64 = arith.constant 0 : index
    %121 = vector.load %arg14[%c0_63, %c0_64] : memref<1x8xf32, #tpu.memory_space<vmem>>, vector<1x8xf32>
    %122 = vector.broadcast %121 : vector<1x8xf32> to vector<16x8xf32>
    %123 = arith.addf %120, %122 : vector<16x8xf32>
    %c0_65 = arith.constant 0 : index
    %c0_66 = arith.constant 0 : index
    %124 = vector.load %arg2[%c0_65, %c0_66] : memref<16x8xf32, #tpu.memory_space<vmem>>, vector<16x8xf32>
    %cst_67 = arith.constant 5.000000e-01 : f32
    %125 = vector.broadcast %cst_67 : f32 to vector<16x8xf32>
    %126 = arith.mulf %125, %123 : vector<16x8xf32>
    %127 = math.exp %126 : vector<16x8xf32>
    %128 = arith.mulf %124, %127 : vector<16x8xf32>
    %129 = arith.addf %118, %128 : vector<16x8xf32>
    %cst_68 = arith.constant dense<0.000000e+00> : vector<8xf32>
    %130 = vector.multi_reduction <add>, %129, %cst_68 [0] : vector<16x8xf32> to vector<8xf32>
    %131 = vector.shape_cast %130 : vector<8xf32> to vector<1x8xf32>
    %cst_69 = arith.constant 1.600000e+01 : f32
    %132 = vector.broadcast %cst_69 : f32 to vector<1x8xf32>
    %133 = arith.divf %131, %132 : vector<1x8xf32>
    %c0_70 = arith.constant 0 : index
    %c0_71 = arith.constant 0 : index
    %134 = vector.load %arg15[%c0_70, %c0_71] : memref<1x8xf32, #tpu.memory_space<vmem>>, vector<1x8xf32>
    tpu.vector_store %arg15[%c0_70, %c0_71], %133 {strides = array<i32>} : memref<1x8xf32, #tpu.memory_space<vmem>>, vector<1x8xf32>,
    return
  }
}

</mosaic_0001>

<bundles_post_ra>
// kernel: tpu_custom_call.1
= control target key start
LH: loop header
LB: loop body
LE: loop exit
PB: predicated region body
PF: predicated region fallthrough
CT: control target
= control target key end

     0   :  { %vm62_vm0 = vcmask 1043456   ;;  %v1070_v2 = vmov 0.0   ;;  %vm1071_vm1 = vmmov 0   ;;  %vm58_vm2 = vcmask 64512   ;;  %s1324_s0 = inlined_call_operand.vmem [shape: f32[16,8], index: 0, kind: input, shape index: {}]   ;;  %s1325_s1 = inlined_call_operand.vmem [shape: f32[16,16], index: 1, kind: input, shape index: {}]   ;;  %s1326_s2 = inlined_call_operand.vmem [shape: f32[16,8], index: 2, kind: input, shape index: {}]   ;;  %s1327_s3 = inlined_call_operand.vmem [shape: bf16[2,8,8], index: 3, kind: input, shape index: {}]   ;;  %s1328_s4 = inlined_call_operand.vmem [shape: bf16[8,2], index: 4, kind: input, shape index: {}]   ;;  %s1329_s5 = inlined_call_operand.vmem [shape: bf16[2,8], index: 5, kind: input, shape index: {}]   ;;  %s1330_s6 = inlined_call_operand.vmem [shape: f32[2,1,8], index: 6, kind: input, shape index: {}]   ;;  %s1331_s7 = inlined_call_operand.vmem [shape: bf16[2,8,8], index: 7, kind: input, shape index: {}]   ;;  %s1332_s8 = inlined_call_operand.vmem [shape: bf16[1,8], index: 8, kind: input, shape index: {}]   ;;  %s1333_s9 = inlined_call_operand.vmem [shape: bf16[8,1], index: 9, kind: input, shape index: {}]   ;;  %s1334_s10 = inlined_call_operand.vmem [shape: f32[1,8], index: 10, kind: input, shape index: {}]   ;;  %s1335_s11 = inlined_call_operand.vmem [shape: bf16[8,8], index: 11, kind: input, shape index: {}]   ;;  %s1336_s12 = inlined_call_operand.vmem [shape: f32[1,8], index: 12, kind: input, shape index: {}]   ;;  %s1337_s13 = inlined_call_operand.vmem [shape: bf16[8,8], index: 13, kind: input, shape index: {}]   ;;  %s1338_s14 = inlined_call_operand.vmem [shape: f32[1,8], index: 14, kind: input, shape index: {}]   ;;  %s1339_s15 = inlined_call_operand.hbm [shape: f32[1,8], index: 15, kind: output, shape index: {}]  }
   0x1   :  { %v57_v0 = vld [vmem:[%s1328_s4] sm:$0xf]  ;;  %928 = vmatprep.subr.bf16.mxu0 %v1070_v2  ;;  %930 = vmatprep.mubr.msk.bf16.mxu0 %vm1071_vm1, %v1070_v2  ;;  %v53_v4 = vld [vmem:[%s1324_s0 + $0x8] sm:$0xff] }
   0x2   :  { %v52_v1 = vld [vmem:[%s1324_s0] sm:$0xff]  ;;  %v64_v3 = vsel %vm62_vm0, %v57_v0, 0  ;;  %934 = vmatprep.subr.bf16.mxu1 %v1070_v2 }
   0x3   :  { %929 = vmatpush3.bf16.msra.mxu0 %v64_v3  ;;  %v54_v5 = vpack.c.bf16 %v53_v4, %v52_v1 }
   0x4   :  { %20 = vsyncpa [#allocation3], 0  ;;  %936 = vmatprep.mubr.msk.bf16.mxu1 %vm1071_vm1, %v1070_v2  ;;  %v1072_v6 = vmov 1   ;;  %v1073_v8 = vmov 0   ;;  %940 = vmatprep.subr.bf16.mxu0 %v1070_v2  ;;  %v107_v9 = vld [vmem:[%s1329_s5] sm:$0x1]  ;;  %v207_v22 = vlaneseq }
   0x5   :  { %1016 = vset.pattern.permute.xlu1 %v1072_v6  ;;  %v60_v7 = vsel %vm58_vm2, %v54_v5, 0  ;;  %1015 = vset.pattern.permute.xlu0 %v1073_v8  ;;  %v151_v18 = vld [vmem:[%s1327_s3] sm:$0xf]  ;;  %v886_v19 = vld [vmem:[%s1327_s3 + $0x4] sm:$0xf]  ;;  %vm221_vm5 = vcmask 130048  }
   0x6   :  { %931 = vmatmul.mubr.msk.bf16.vlgmr.msra.gmra.mrb[0].mxu0 %vm58_vm2, %v54_v5  ;;  %935 = vmatpush3.bf16.xpose.msra.mxu1 %v60_v7  ;;  %v153_v20 = vsel %vm62_vm0, %v151_v18, 0  ;;  %v303_v21 = vsel %vm62_vm0, %v886_v19, 0  ;;  %v1199_v23 = vshrl.u32 %v207_v22, 7  ;;  %v1208_v32 = vld [vmem:[%s1325_s1] sm:$0xff]  ;;  %v1214_v42 = vld [vmem:[%s1325_s1 + $0x8] sm:$0xff]  ;;  %vm865_vm10 = vcmask 57344  }
   0x7   :  { %942 = vmatprep.mubr.msk.bf16.mxu0 %vm1071_vm1, %v1070_v2  ;;  %946 = vmatprep.subr.bf16.mxu1 %v1070_v2 }
   0x8   :  { %941 = vmatpush3.bf16.msra.mxu0 %v153_v20  ;;  %v209_v24 = vsub.s32 0, %v1199_v23  ;;  %v357_v25 = vsub.s32 1, %v1199_v23 }
   0x9   :  { %952 = vmatprep.subr.bf16.mxu0 %v1070_v2 }
   0xd   :  { %937 = vmatmul.mubr.msk.bf16.vlgmr.msra.gmra.mrb[0].mxu1 %vm58_vm2, %v107_v9 }
   0xe   :  { %948 = vmatprep.mubr.msk.bf16.mxu1 %vm1071_vm1, %v1070_v2  ;;  %943 = vmatmul.mubr.msk.bf16.vlgmr.msra.gmra.mrb[4].mxu0 %vm58_vm2, %v54_v5 }
   0xf   :  { %953 = vmatpush3.bf16.msra.mxu0 %v303_v21  ;;  %954 = vmatprep.mubr.msk.bf16.mxu0 %vm1071_vm1, %v1070_v2 }
  0x10   :  { %964 = vmatprep.subr.bf16.mxu0 %v1070_v2 }
  0x16   :  { %955 = vmatmul.mubr.msk.bf16.vlgmr.msra.gmra.mrb[8].mxu0 %vm58_vm2, %v54_v5 }
  0x17   :  { %966 = vmatprep.mubr.msk.bf16.mxu0 %vm1071_vm1, %v1070_v2 }
  0xd9   :  { %v100_v10 = vpop.f32.mrb[0].mxu0 }
  0xda   :  { %348 = vperm.xlu1 %1016, %v100_v10   ;;  %199 = vperm.xlu0 %1015, %v100_v10   ;;  %v932_v11 = vpop.f32.mrb[1].mxu0 }
  0xdb   :  { %v103_v12 = vpop.f32.mrb[2].mxu0 }
  0xdc   :  { %v933_v13 = vpop.f32.mrb[3].mxu0 }
  0xde   :  { %352 = vperm.xlu1 %1016, %v103_v12   ;;  %204 = vperm.xlu0 %1015, %v103_v12  }
  0xe0   :  { %v145_v14 = vpop.f32.mrb[0].mxu1 }
  0xe1   :  { %v938_v15 = vpop.f32.mrb[1].mxu1  ;;  %v210_v26 = vrot.slane %v145_v14, %v209_v24  ;;  %v358_v27 = vrot.slane %v145_v14, %v357_v25  ;;  %v189_v11 = vpop.f32.mrb[4].mxu0 }
  0xe2   :  { %v148_v16 = vpop.f32.mrb[2].mxu1  ;;  %1017 = vset.pattern.permute.xlu1 %v1073_v8  ;;  %v944_v12 = vpop.f32.mrb[5].mxu0 }
  0xe3   :  { %v939_v17 = vpop.f32.mrb[3].mxu1  ;;  %v192_v13 = vpop.f32.mrb[6].mxu0 }
  0xe4   :  { %v945_v14 = vpop.f32.mrb[7].mxu0  ;;  %v196_v15 = vpack.c.bf16 %v192_v13, %v189_v11 }
  0xe6   :  { %947 = vmatpush3.bf16.msra.mxu1 %v196_v15 }
  0xe7   :  { %958 = vmatprep.subr.bf16.mxu1 %v1070_v2 }
  0xe9   :  { %v339_v16 = vpop.f32.mrb[8].mxu0 }
  0xea   :  { %v956_v17 = vpop.f32.mrb[9].mxu0 }
  0xeb   :  { %v342_v18 = vpop.f32.mrb[10].mxu0 }
  0xec   :  { %v346_v19 = vpack.c.bf16 %v342_v18, %v339_v16  ;;  %v957_v20 = vpop.f32.mrb[11].mxu0 }
 0x159   :  { %v349_v28 = vpop.permute.xlu1 %348  ;;  %v200_v29 = vpop.permute.xlu0 %199 }
 0x15a   :  { %v359_v30 = vadd.f32 %v358_v27, %v349_v28  ;;  %v211_v31 = vadd.f32 %v210_v26, %v200_v29 }
 0x15c   :  { %vm361_vm3 = vcmp.gt.f32.partialorder %v359_v30, 0.0  ;;  %v363_v33 = vmul.f32 0.2, %v359_v30  ;;  %vm213_vm4 = vcmp.gt.f32.partialorder %v211_v31, 0.0  ;;  %v215_v34 = vmul.f32 0.2, %v211_v31 }
 0x15d   :  { %v353_v35 = vpop.permute.xlu1 %352  ;;  %v205_v36 = vpop.permute.xlu0 %204 }
 0x15e   :  { %v360_v37 = vadd.f32 %v358_v27, %v353_v35  ;;  %v212_v38 = vadd.f32 %v210_v26, %v205_v36  ;;  %v217_v39 = vsel %vm213_vm4, %v211_v31, %v215_v34  ;;  %v365_v40 = vsel %vm361_vm3, %v359_v30, %v363_v33 }
 0x15f   :  { %v219_v41 = vadd.f32 %v217_v39, %v1208_v32  ;;  %v367_v46 = vadd.f32 %v365_v40, %v1208_v32  ;;  %v544_v40 = vld [vmem:[%s1333_s9] sm:$0xf] }
 0x160   :  { %vm362_vm6 = vcmp.gt.f32.partialorder %v360_v37, 0.0  ;;  %v364_v43 = vmul.f32 0.2, %v360_v37  ;;  %vm214_vm7 = vcmp.gt.f32.partialorder %v212_v38, 0.0  ;;  %v216_v44 = vmul.f32 0.2, %v212_v38 }
 0x161   :  { %v222_v45 = vsel %vm221_vm5, %v219_v41, -inf  ;;  %v369_v51 = vsel %vm221_vm5, %v367_v46, -inf }
 0x162   :  { %223 = vmax.xlane.f32.xlu0 %v222_v45  ;;  %v218_v47 = vsel %vm214_vm7, %v212_v38, %v216_v44  ;;  %v366_v48 = vsel %vm362_vm6, %v360_v37, %v364_v43  ;;  %v891_v38 = vld [vmem:[%s1331_s7 + $0x4] sm:$0xf]  ;;  %v884_v43 = vld [vmem:[%s1330_s6] ss:$0 sm:$0xff] }
 0x163   :  { %v220_v49 = vadd.f32 %v218_v47, %v1214_v42  ;;  %v368_v52 = vadd.f32 %v366_v48, %v1214_v42  ;;  %v453_v39 = vsel %vm62_vm0, %v891_v38, 0 }
 0x164   :  { %965 = vmatpush3.bf16.msra.mxu0 %v453_v39 }
 0x165   :  { %v225_v50 = vsel %vm221_vm5, %v220_v49, -inf  ;;  %v372_v53 = vsel %vm221_vm5, %v368_v52, -inf  ;;  %970 = vmatprep.subr.bf16.mxu0 %v1070_v2 }
 0x166   :  { %226 = vmax.xlane.f32.xlu1 %v225_v50  ;;  %370 = vmax.xlane.f32.xlu0 %v369_v51 }
 0x16a   :  { %373 = vmax.xlane.f32.xlu0 %v372_v53 }
 0x1ef   :  { %v224_v54 = vpop.xlane.xlu0 %223 }
 0x1f0   :  { %v228_v55 = vsub.f32 %v219_v41, %v224_v54  ;;  %v549_v41 = vsel %vm62_vm0, %v544_v40, 0 }
 0x1f2   :  { %v230_v56 = vmul.f32 1.442695, %v228_v55 }
 0x1f3   :  { %v227_v57 = vpop.xlane.xlu1 %226  ;;  %v371_v58 = vpop.xlane.xlu0 %370 }
 0x1f4   :  { %1018 = vpow2.f32 %v230_v56  ;;  %v229_v59 = vsub.f32 %v220_v49, %v227_v57  ;;  %v375_v60 = vsub.f32 %v367_v46, %v371_v58 }
 0x1f6   :  { %v232_v61 = vmul.f32 1.442695, %v229_v59  ;;  %v377_v62 = vmul.f32 1.442695, %v375_v60  ;;  %v299_v60 = vld [vmem:[%s1331_s7] sm:$0xf] }
 0x1f7   :  { %v374_v63 = vpop.xlane.xlu0 %373 }
 0x1f8   :  { %1020 = vpow2.f32 %v232_v61  ;;  %v376_v0 = vsub.f32 %v368_v52, %v374_v63  ;;  %v889_v52 = vld [vmem:[%s1330_s6 + $0x1] ss:$0 sm:$0xff] }
 0x1f9   :  { %1022 = vpow2.f32 %v377_v62 }
 0x1fa   :  { %v379_v1 = vmul.f32 1.442695, %v376_v0  ;;  %v500_v0 = vsel %vm62_vm0, %v299_v60, 0 }
 0x1fc   :  { %1024 = vpow2.f32 %v379_v1 }
 0x1fe   :  { %v1019_v3 = vpop.eup %1018 }
 0x1ff   :  { %v234_v4 = vsel %vm221_vm5, %v1019_v3, 0.0 }
 0x200   :  { %235 = vadd.xlane.f32.xlu1 %v234_v4 }
 0x202   :  { %v1021_v5 = vpop.eup %1020 }
 0x203   :  { %v1023_v6 = vpop.eup %1022  ;;  %v237_v7 = vsel %vm221_vm5, %v1021_v5, 0.0 }
 0x204   :  { %238 = vadd.xlane.f32.xlu0 %v237_v7  ;;  %v381_v8 = vsel %vm221_vm5, %v1023_v6, 0.0 }
 0x205   :  { %382 = vadd.xlane.f32.xlu1 %v381_v8  ;;  %v592_v8 = vld [vmem:[%s1332_s8] sm:$0x1] }
 0x206   :  { %v1025_v9 = vpop.eup %1024 }
 0x207   :  { %v384_v10 = vsel %vm221_vm5, %v1025_v9, 0.0 }
 0x208   :  { %385 = vadd.xlane.f32.xlu0 %v384_v10 }
 0x28d   :  { %v236_v21 = vpop.xlane.xlu1 %235 }
 0x28e   :  { %1026 = vrcp.f32 %v236_v21 }
 0x291   :  { %v239_v22 = vpop.xlane.xlu0 %238 }
 0x292   :  { %1028 = vrcp.f32 %v239_v22  ;;  %v383_v25 = vpop.xlane.xlu1 %382 }
 0x295   :  { %v386_v26 = vpop.xlane.xlu0 %385 }
 0x296   :  { %1030 = vrcp.f32 %v386_v26 }
 0x297   :  { %1032 = vrcp.f32 %v383_v25 }
 0x298   :  { %v1027_v27 = vpop.eup %1026 }
 0x299   :  { %v242_v29 = vmul.f32 %v1027_v27, %v1019_v3 }
 0x29c   :  { %v1029_v28 = vpop.eup %1028 }
 0x29d   :  { %v243_v30 = vmul.f32 %v1029_v28, %v1021_v5 }
 0x29f   :  { %v244_v31 = vpack.c.bf16 %v243_v30, %v242_v29 }
 0x2a0   :  { %v1031_v33 = vpop.eup %1030 }
 0x2a1   :  { %949 = vmatmul.mubr.msk.bf16.vlgmr.msra.gmra.mrb[4].mxu1 %vm221_vm5, %v244_v31  ;;  %v1033_v34 = vpop.eup %1032  ;;  %v390_v35 = vmul.f32 %v1031_v33, %v1025_v9 }
 0x2a2   :  { %959 = vmatpush3.bf16.msra.mxu1 %v346_v19  ;;  %960 = vmatprep.mubr.msk.bf16.mxu1 %vm1071_vm1, %v1070_v2  ;;  %v389_v36 = vmul.f32 %v1033_v34, %v1023_v6 }
 0x2a3   :  { %976 = vmatprep.subr.bf16.mxu1 %v1070_v2 }
 0x2a4   :  { %v391_v37 = vpack.c.bf16 %v390_v35, %v389_v36 }
 0x2a9   :  { %961 = vmatmul.mubr.msk.bf16.vlgmr.msra.gmra.mrb[8].mxu1 %vm221_vm5, %v391_v37 }
 0x2aa   :  { %978 = vmatprep.mubr.msk.bf16.mxu1 %vm1071_vm1, %v1070_v2  ;;  %977 = vmatpush3.bf16.msra.mxu1 %v549_v41 }
 0x2ab   :  { %982 = vmatprep.subr.bf16.mxu1 %v1070_v2 }
 0x374   :  { %v289_v44 = vpop.f32.mrb[4].mxu1 }
 0x375   :  { %v290_v45 = vadd.f32 %v884_v43, %v289_v44  ;;  %v950_v46 = vpop.f32.mrb[5].mxu1  ;;  %v790_v44 = vld [vmem:[%s1337_s13] sm:$0xf] }
 0x376   :  { %v292_v47 = vpop.f32.mrb[6].mxu1 }
 0x377   :  { %v293_v48 = vadd.f32 %v884_v43, %v292_v47  ;;  %v951_v49 = vpop.f32.mrb[7].mxu1  ;;  %v296_v50 = vmax.f32 %v290_v45, 0.0 }
 0x378   :  { %v735_v49 = vld [vmem:[%s1335_s11] sm:$0xf] }
 0x379   :  { %v297_v51 = vmax.f32 %v293_v48, 0.0  ;;  %v799_v48 = vsel %vm62_vm0, %v790_v44, 0 }
 0x37b   :  { %v298_v53 = vpack.c.bf16 %v297_v51, %v296_v50  ;;  %v747_v50 = vsel %vm62_vm0, %v735_v49, 0  ;;  %v896_v51 = vld [vmem:[%s1334_s10] ss:$0 sm:$0xff] }
 0x37c   :  { %v437_v54 = vpop.f32.mrb[8].mxu1 }
 0x37d   :  { %v438_v55 = vadd.f32 %v889_v52, %v437_v54  ;;  %v962_v56 = vpop.f32.mrb[9].mxu1 }
 0x37e   :  { %v440_v57 = vpop.f32.mrb[10].mxu1 }
 0x37f   :  { %v441_v58 = vadd.f32 %v889_v52, %v440_v57  ;;  %v963_v59 = vpop.f32.mrb[11].mxu1  ;;  %v444_v61 = vmax.f32 %v438_v55, 0.0 }
 0x381   :  { %v445_v62 = vmax.f32 %v441_v58, 0.0 }
 0x383   :  { %v446_v63 = vpack.c.bf16 %v445_v62, %v444_v61 }
 0x385   :  { %967 = vmatmul.mubr.msk.bf16.vlgmr.msra.gmra.mrb[12].mxu0 %vm58_vm2, %v446_v63 }
 0x386   :  { %971 = vmatpush3.bf16.msra.mxu0 %v500_v0  ;;  %972 = vmatprep.mubr.msk.bf16.mxu0 %vm1071_vm1, %v1070_v2 }
 0x387   :  { %988 = vmatprep.subr.bf16.mxu0 %v1070_v2 }
 0x391   :  { %973 = vmatmul.mubr.msk.bf16.vlgmr.msra.gmra.mrb[12].mxu0 %vm58_vm2, %v298_v53 }
 0x392   :  { %990 = vmatprep.mubr.msk.bf16.mxu0 %vm1071_vm1, %v1070_v2 }
 0x464   :  { %v536_v1 = vpop.f32.mrb[12].mxu0 }
 0x465   :  { %v974_v3 = vpop.f32.mrb[13].mxu0 }
 0x466   :  { %v539_v4 = vpop.f32.mrb[14].mxu0 }
 0x467   :  { %v543_v5 = vpack.c.bf16 %v539_v4, %v536_v1  ;;  %v975_v6 = vpop.f32.mrb[15].mxu0 }
 0x469   :  { %979 = vmatmul.mubr.msk.bf16.vlgmr.msra.gmra.mrb[12].mxu1 %vm58_vm2, %v543_v5  ;;  %989 = vmatpush3.bf16.msra.mxu0 %v543_v5  ;;  %v546_v7 = vsel %vm58_vm2, %v543_v5, 0 }
 0x46a   :  { %983 = vmatpush3.bf16.xpose.msra.mxu1 %v546_v7  ;;  %984 = vmatprep.mubr.msk.bf16.mxu1 %vm1071_vm1, %v1070_v2 }
 0x46b   :  { %1000 = vmatprep.subr.bf16.mxu0 %v1070_v2  ;;  %994 = vmatprep.subr.bf16.mxu1 %v1070_v2 }
 0x471   :  { %985 = vmatmul.mubr.msk.bf16.vlgmr.msra.gmra.mrb[16].mxu1 %vm58_vm2, %v592_v8 }
 0x472   :  { %996 = vmatprep.mubr.msk.bf16.mxu1 %vm1071_vm1, %v1070_v2  ;;  %995 = vmatpush3.bf16.msra.mxu1 %v747_v50 }
 0x53c   :  { %v585_v9 = vpop.f32.mrb[12].mxu1 }
 0x53d   :  { %638 = vperm.xlu1 %1017, %v585_v9   ;;  %v980_v10 = vpop.f32.mrb[13].mxu1 }
 0x53e   :  { %v588_v11 = vpop.f32.mrb[14].mxu1  ;;  %v898_v10 = vld [vmem:[%s1336_s12] ss:$0 sm:$0xff]  ;;  %s1074_s12 = smov [#allocation2]  }
 0x53f   :  { %643 = vperm.xlu0 %1015, %v588_v11   ;;  %v981_v12 = vpop.f32.mrb[15].mxu1  ;;  %v842_v11 = vld [vmem:[%s1326_s2] sm:$0xff]  ;;  %s873_s28 = sshll.u32 %s1074_s12, 4  ;;  %s874_s28 = int_to_ptr.vmem [resolvable:$true] %s873_s28 }
 0x540   :  { %s1050_s29 = scalar_lea.vmem %s874_s28, 32  ;;  %p1051_p1 = scmp.lt.s32.totalorder %s874_s28, %s874_s28 }
 0x544   :  { %v630_v13 = vpop.f32.mrb[16].mxu1 }
 0x545   :  { %v986_v14 = vpop.f32.mrb[17].mxu1  ;;  %v649_v17 = vrot.slane %v630_v13, %v209_v24  ;;  %v843_v13 = vld [vmem:[%s1326_s2 + $0x8] sm:$0xff]  ;;  %s1046_s2 = scalar_lea.vmem %s874_s28, 16 }
 0x546   :  { %v633_v15 = vpop.f32.mrb[18].mxu1  ;;  %p1047_p0 = scmp.ne.s32.totalorder %s874_s28, %s1046_s2  ;;  %p1052_p2 = scmp.lt.s32.totalorder %s1050_s29, %s1046_s2 }
 0x547   :  { %v987_v16 = vpop.f32.mrb[19].mxu1 }
 0x548   :  { %p1053_p3 = por %p1052_p2, %p1051_p1 }
 0x54a   :  { %p1054_p4 = pnand %p1053_p3, %p1047_p0 }
 0x5bc   :  { %v639_v18 = vpop.permute.xlu1 %638 }
 0x5bd   :  { %v650_v19 = vadd.f32 %v649_v17, %v639_v18 }
 0x5be   :  { %v644_v20 = vpop.permute.xlu0 %643 }
 0x5bf   :  { %vm652_vm8 = vcmp.gt.f32.partialorder %v650_v19, 0.0  ;;  %v654_v21 = vmul.f32 0.2, %v650_v19  ;;  %v651_v22 = vadd.f32 %v649_v17, %v644_v20 }
 0x5c1   :  { %vm653_vm9 = vcmp.gt.f32.partialorder %v651_v22, 0.0  ;;  %v655_v25 = vmul.f32 0.2, %v651_v22  ;;  %v656_v26 = vsel %vm652_vm8, %v650_v19, %v654_v21 }
 0x5c2   :  { %v658_v27 = vadd.f32 %v656_v26, %v1208_v32 }
 0x5c3   :  { %v657_v28 = vsel %vm653_vm9, %v651_v22, %v655_v25 }
 0x5c4   :  { %v660_v29 = vsel %vm221_vm5, %v658_v27, -inf  ;;  %v659_v30 = vadd.f32 %v657_v28, %v1214_v42 }
 0x5c5   :  { %661 = vmax.xlane.f32.xlu1 %v660_v29 }
 0x5c6   :  { %v663_v23 = vsel %vm221_vm5, %v659_v30, -inf }
 0x5c7   :  { %664 = vmax.xlane.f32.xlu0 %v663_v23 }
 0x652   :  { %v662_v24 = vpop.xlane.xlu1 %661 }
 0x653   :  { %v666_v31 = vsub.f32 %v658_v27, %v662_v24 }
 0x654   :  { %v665_v33 = vpop.xlane.xlu0 %664 }
 0x655   :  { %v668_v34 = vmul.f32 1.442695, %v666_v31  ;;  %v667_v35 = vsub.f32 %v659_v30, %v665_v33 }
 0x657   :  { %1034 = vpow2.f32 %v668_v34  ;;  %v670_v36 = vmul.f32 1.442695, %v667_v35 }
 0x659   :  { %1036 = vpow2.f32 %v670_v36 }
 0x661   :  { %v1035_v37 = vpop.eup %1034 }
 0x662   :  { %v672_v32 = vsel %vm221_vm5, %v1035_v37, 0.0 }
 0x663   :  { %v1037_v38 = vpop.eup %1036  ;;  %673 = vadd.xlane.f32.xlu1 %v672_v32 }
 0x664   :  { %v675_v39 = vsel %vm221_vm5, %v1037_v38, 0.0 }
 0x665   :  { %676 = vadd.xlane.f32.xlu0 %v675_v39 }
 0x6f0   :  { %v674_v42 = vpop.xlane.xlu1 %673 }
 0x6f1   :  { %1038 = vrcp.f32 %v674_v42 }
 0x6f2   :  { %v677_v40 = vpop.xlane.xlu0 %676 }
 0x6f3   :  { %1040 = vrcp.f32 %v677_v40 }
 0x6fb   :  { %v1039_v41 = vpop.eup %1038 }
 0x6fc   :  { %v680_v45 = vmul.f32 %v1039_v41, %v1035_v37 }
 0x6fd   :  { %v1041_v43 = vpop.eup %1040 }
 0x6fe   :  { %v681_v46 = vmul.f32 %v1041_v43, %v1037_v38 }
 0x700   :  { %v682_v47 = vpack.c.bf16 %v681_v46, %v680_v45 }
 0x702   :  { %991 = vmatmul.mubr.msk.bf16.vlgmr.msra.gmra.mrb[16].mxu0 %vm221_vm5, %v682_v47 }
 0x703   :  { %1001 = vmatpush3.bf16.msra.mxu0 %v799_v48  ;;  %1002 = vmatprep.mubr.msk.bf16.mxu0 %vm1071_vm1, %v1070_v2  ;;  %v900_v2 = vld [vmem:[%s1338_s14] ss:$0 sm:$0xff] }
 0x7d5   :  { %v727_v52 = vpop.f32.mrb[16].mxu0 }
 0x7d6   :  { %v992_v53 = vpop.f32.mrb[17].mxu0  ;;  %v728_v55 = vadd.f32 %v896_v51, %v727_v52 }
 0x7d7   :  { %v730_v54 = vpop.f32.mrb[18].mxu0 }
 0x7d8   :  { %v731_v56 = vadd.f32 %v896_v51, %v730_v54  ;;  %v993_v57 = vpop.f32.mrb[19].mxu0 }
 0x7da   :  { %v734_v58 = vpack.c.bf16 %v731_v56, %v728_v55 }
 0x7dc   :  { %997 = vmatmul.mubr.msk.bf16.vlgmr.msra.gmra.mrb[20].mxu1 %vm58_vm2, %v734_v58  ;;  %1003 = vmatmul.mubr.msk.bf16.vlgmr.msra.gmra.mrb[20].mxu0 %vm58_vm2, %v734_v58 }
 0x8af   :  { %v783_v59 = vpop.f32.mrb[20].mxu1  ;;  %v835_v60 = vpop.f32.mrb[20].mxu0 }
 0x8b0   :  { %v836_v61 = vadd.f32 %v900_v2, %v835_v60  ;;  %v998_v62 = vpop.f32.mrb[21].mxu1  ;;  %v1004_v63 = vpop.f32.mrb[21].mxu0  ;;  %v784_v14 = vadd.f32 %v898_v10, %v783_v59 }
 0x8b1   :  { %v786_v0 = vpop.f32.mrb[22].mxu1  ;;  %v838_v1 = vpop.f32.mrb[22].mxu0 }
 0x8b2   :  { %v844_v3 = vmul.f32 0.5, %v836_v61  ;;  %v839_v4 = vadd.f32 %v900_v2, %v838_v1  ;;  %v999_v5 = vpop.f32.mrb[23].mxu1  ;;  %v1005_v6 = vpop.f32.mrb[23].mxu0  ;;  %v787_v17 = vadd.f32 %v898_v10, %v786_v0 }
 0x8b4   :  { %v846_v7 = vmul.f32 1.442695, %v844_v3  ;;  %v845_v8 = vmul.f32 0.5, %v839_v4 }
 0x8b6   :  { %1042 = vpow2.f32 %v846_v7  ;;  %v848_v9 = vmul.f32 1.442695, %v845_v8 }
 0x8b8   :  { %1044 = vpow2.f32 %v848_v9 }
 0x8c0   :  { %v1043_v12 = vpop.eup %1042 }
 0x8c1   :  { %v850_v15 = vmul.f32 %v1043_v12, %v842_v11 }
 0x8c2   :  { %v1045_v16 = vpop.eup %1044 }
 0x8c3   :  { %v851_v18 = vmul.f32 %v1045_v16, %v843_v13  ;;  %v852_v19 = vadd.f32 %v850_v15, %v784_v14 }
 0x8c5   :  { %v853_v20 = vadd.f32 %v851_v18, %v787_v17  ;;  %v854_v21 = vsel %vm58_vm2, %v852_v19, 0.0 }
 0x8c7   :  { %v855_v22 = vsel %vm58_vm2, %v853_v20, 0.0 }
 0x8c8   :  { %v856_v25 = vadd.f32 %v855_v22, %v854_v21 }
 0x8ca   :  { %v857_v26 = vrot.slane %v856_v25, 4 }
 0x8cc   :  { %v858_v27 = vadd.f32 %v857_v26, %v856_v25 }
 0x8ce   :  { %v859_v28 = vrot.slane %v858_v27, 2 }
 0x8d0   :  { %v860_v29 = vadd.f32 %v859_v28, %v858_v27 }
 0x8d2   :  { %v861_v30 = vrot.slane %v860_v29, 1 }
 0x8d4   :  { %v862_v23 = vadd.f32 %v861_v30, %v860_v29 }
 0x8d6   :  { %v864_v24 = vmul.f32 0.0625, %v862_v23 }
 0x8d8   :  { %866 = vst.msk [vmem:[#allocation2] sm:$0x1] %vm865_vm10, %v864_v24 }
 0x8d9   :  { %1057 = shalt.err (!%p1054_p4)
}
 0x8da   :  { %s1058_s16 = scalar_lea.hbm %s1339_s15, 16 }
 0x8db   :  { %p1059_p5 = scmp.ne.s32.totalorder %s1339_s15, %s1058_s16  ;;  %p1062_p6 = scmp.lt.u32.totalorder %s1058_s16, %s1339_s15 }
 0x8dd   :  { %p1064_p7 = pnand %p1062_p6, %p1059_p5 }
 0x8df   :  { %1067 = shalt.err (!%p1064_p7)
}
 0x8e0   :  { %876 = dma.vmem_to_hbm [thread:$0]  %s874_s28, 16, %s1339_s15, [#allocation3]  }
 0x8e1   :  { %1068 = dma.done.wait [#allocation3], 16  }
 0x8e2   :  { %1069 = vsyncadd [#allocation3], 4294967280 }
 0x8e3   :  { %880 = vsyncpa [#allocation3], 1 }

</bundles_post_ra>
